<compile_context>
chip_gen: v5e
topology: v5e:2x2
jax: 0.10.0
libtpu: 0.0.40
codegen_flags: <defaults>
</compile_context>

<pallas_src>
import functools

import jax
import jax.numpy as jnp
from jax.experimental import pallas as pl
from jax.experimental.pallas import tpu as pltpu


def _conv3x3_bn_relu_kernel(x_ref, w_ref, scale_ref, shift_ref, o_ref):
    """One grid step == one (batch, row-tile) slab.

    x_ref:     (1, TILE_H+2, W+2, Cin)  bf16, spatially padded row slab (halo=2)
    w_ref:     (9*Cin, Cpad)            bf16, im2col-flattened conv weights
    scale_ref: (1, Cpad)                f32, folded BN scale = gamma/sqrt(var+eps)
    shift_ref: (1, Cpad)                f32, folded BN shift = beta - mean*scale
    o_ref:     (1, TILE_H*W, Cpad)      f32 output (lane-dense last dim)
    """
    th = x_ref.shape[1] - 2
    w = x_ref.shape[2] - 2
    cin = x_ref.shape[3]

    xt = x_ref[0]                                        # (TILE_H+2, W+2, Cin)

    # im2col: 9 shifted taps concatenated along channels -> K = 9*Cin.
    parts = [xt[kh:kh + th, kw:kw + w, :]
             for kh in range(3) for kw in range(3)]
    patches = jnp.concatenate(parts, axis=-1)            # (TILE_H, W, 9*Cin)
    patches = patches.reshape(th * w, 9 * cin)           # (TILE_H*W, 9*Cin)

    # Single lane-dense MXU matmul: bf16 inputs, f32 accumulation.
    acc = jax.lax.dot_general(
        patches, w_ref[...],
        dimension_numbers=(((1,), (0,)), ((), ())),
        preferred_element_type=jnp.float32)              # (TILE_H*W, Cpad)

    # Fused BatchNorm (inference) + ReLU, f32 epilogue, lane-dense store.
    y = acc * scale_ref[0] + shift_ref[0]
    o_ref[0] = jnp.maximum(y, 0.0).astype(o_ref.dtype)


def _round_up(v, m):
    return (v + m - 1) // m * m


def _choose_tile_h(h, w, cpad):
    """Largest divisor of H keeping the matmul M dim and the f32 result bounded."""
    best = 1
    for d in range(1, h + 1):
        if h % d:
            continue
        m = d * w
        if m <= 512 and m * cpad * 4 <= 4 * 1024 * 1024:
            best = d
    return best


@functools.partial(jax.jit, static_argnames=("eps", "tile_h"))
def conv3x3_bn_relu(x_nchw, weight_oihw, gamma, beta, running_mean,
                    running_var, eps=1e-5, tile_h=None):
    """Forward of Conv3x3 (stride=1, groups=1, bias=False) + BN(eval) + ReLU.

    x_nchw:      (N, Cin, H, W)
    weight_oihw: (Cout, Cin, 3, 3)   -- PyTorch conv weight layout
    returns:     (N, Cout, H, W) float32
    """
    # TODO(synk): stride > 1 and groups > 1 Conv3x3 variants are not implemented
    # (the module defaults stride=1, groups=1 are what this kernel covers).
    N, Cin, H, W = x_nchw.shape
    Cout = weight_oihw.shape[0]
    Cpad = _round_up(Cout, 128)

    if tile_h is None:
        tile_h = _choose_tile_h(H, W, Cpad)
    assert H % tile_h == 0, "tile_h must divide H"
    n_h = H // tile_h

    # NCHW -> NHWC, bf16, zero pad (padding=1): cheap XLA glue, fused by XLA.
    x_nhwc = jnp.transpose(x_nchw, (0, 2, 3, 1)).astype(jnp.bfloat16)
    x_pad = jnp.pad(x_nhwc, ((0, 0), (1, 1), (1, 1), (0, 0)))

    # Overlapping row slabs with a 2-row halo, flattened over (N, n_h):
    # (N*n_h, tile_h+2, W+2, Cin)
    x_slabs = jnp.stack(
        [x_pad[:, i * tile_h:i * tile_h + tile_h + 2] for i in range(n_h)],
        axis=1).reshape(N * n_h, tile_h + 2, W + 2, Cin)

    # (Cout, Cin, 3, 3) -> (3, 3, Cin, Cout) -> (9*Cin, Cpad), bf16.
    w = jnp.transpose(weight_oihw, (2, 3, 1, 0)).reshape(9 * Cin, Cout)
    w = jnp.pad(w.astype(jnp.bfloat16), ((0, 0), (0, Cpad - Cout)))

    # Fold BatchNorm (eval) into per-channel scale/shift, padded to Cpad.
    scale = (gamma / jnp.sqrt(running_var + eps)).astype(jnp.float32)
    shift = (beta - running_mean * scale).astype(jnp.float32)
    scale = jnp.pad(scale, (0, Cpad - Cout)).reshape(1, Cpad)
    shift = jnp.pad(shift, (0, Cpad - Cout)).reshape(1, Cpad)

    flops = 2 * N * H * W * 9 * Cin * Cout
    bytes_accessed = (x_slabs.size * 2 + w.size * 2 + 2 * Cpad * 4
                      + N * H * W * Cpad * 4)

    out = pl.pallas_call(
        _conv3x3_bn_relu_kernel,
        out_shape=jax.ShapeDtypeStruct((N * n_h, tile_h * W, Cpad), jnp.float32),
        grid_spec=pltpu.PrefetchScalarGridSpec(
            num_scalar_prefetch=0,
            grid=(N * n_h,),
            in_specs=[
                pl.BlockSpec((1, tile_h + 2, W + 2, Cin),
                             lambda i: (i, 0, 0, 0)),
                pl.BlockSpec((9 * Cin, Cpad), lambda i: (0, 0)),
                pl.BlockSpec((1, Cpad), lambda i: (0, 0)),
                pl.BlockSpec((1, Cpad), lambda i: (0, 0)),
            ],
            out_specs=pl.BlockSpec((1, tile_h * W, Cpad),
                                   lambda i: (i, 0, 0)),
        ),
        compiler_params=pltpu.CompilerParams(
            dimension_semantics=("parallel",),
            vmem_limit_bytes=32 * 1024 * 1024),
        cost_estimate=pl.CostEstimate(flops=flops, transcendentals=0,
                                      bytes_accessed=bytes_accessed),
    )(x_slabs, w, scale, shift)

    # (N*n_h, tile_h*W, Cpad) -> (N, H, W, Cout) -> NCHW (one fused XLA pass).
    out = out.reshape(N, H, W, Cpad)[..., :Cout]
    return jnp.transpose(out, (0, 3, 1, 2))


def _reference(x_nchw, weight_oihw, gamma, beta, mean, var, eps=1e-5):
    """Pure-JAX reference, bf16-rounded inputs to match MXU numerics."""
    xb = x_nchw.astype(jnp.bfloat16).astype(jnp.float32)
    wb = weight_oihw.astype(jnp.bfloat16).astype(jnp.float32)
    y = jax.lax.conv_general_dilated(
        xb, wb, window_strides=(1, 1), padding=((1, 1), (1, 1)),
        dimension_numbers=("NCHW", "OIHW", "NCHW"))
    scale = gamma / jnp.sqrt(var + eps)
    shift = beta - mean * scale
    y = y * scale[None, :, None, None] + shift[None, :, None, None]
    return jnp.maximum(y, 0.0)


if __name__ == "__main__":
    key = jax.random.PRNGKey(0)
    k_x, k_w, k_g, k_b, k_m, k_v = jax.random.split(key, 6)

    N, Cin, H, W = 2, 4, 16, 16
    Cout = 8

    x = jax.random.normal(k_x, (N, Cin, H, W), dtype=jnp.float32)
    weight = jax.random.normal(k_w, (Cout, Cin, 3, 3), dtype=jnp.float32) * 0.1
    gamma = 1.0 + 0.1 * jax.random.normal(k_g, (Cout,), dtype=jnp.float32)
    beta = 0.1 * jax.random.normal(k_b, (Cout,), dtype=jnp.float32)
    running_mean = 0.1 * jax.random.normal(k_m, (Cout,), dtype=jnp.float32)
    running_var = jnp.abs(1.0 + 0.1 * jax.random.normal(k_v, (Cout,),
                                                        dtype=jnp.float32))

    ref = _reference(x, weight, gamma, beta, running_mean, running_var)

    # Exercise both the explicit row-tiled path (n_h=2) and the auto-tiled path.
    for th in (8, None):
        out = conv3x3_bn_relu(x, weight, gamma, beta, running_mean,
                              running_var, tile_h=th)
        out = jax.block_until_ready(out)
        assert out.shape == (N, Cout, H, W)
        assert jnp.allclose(out, ref, atol=1e-2, rtol=1e-2), \
            f"mismatch vs reference (tile_h={th})"

    print("KERNEL_OK")
</pallas_src>

<mosaic_0001>
module attributes {stable_mosaic.version = 11 : i64} {
  func.func @_conv3x3_bn_relu_kernel(%arg0: i32, %arg1: memref<1x10x18x4xbf16, #tpu.memory_space<vmem>>, %arg2: memref<36x128xbf16, #tpu.memory_space<vmem>>, %arg3: memref<1x128xf32, #tpu.memory_space<vmem>>, %arg4: memref<1x128xf32, #tpu.memory_space<vmem>>, %arg5: memref<1x128x128xf32, #tpu.memory_space<vmem>>) attributes {dimension_semantics = [#tpu.dimension_semantics<parallel>], iteration_bounds = array<i64: 4>, scalar_prefetch = 0 : i64, scratch_operands = 0 : i64, tpu.core_type = #tpu.core_type<tc>, window_params = [{transform_indices = @transform_0, window_bounds = array<i64: 1, 10, 18, 4>}, {pipeline_mode = #tpu.pipeline_mode<synchronous>, transform_indices = @transform_1, window_bounds = array<i64: 36, 128>}, {pipeline_mode = #tpu.pipeline_mode<synchronous>, transform_indices = @transform_2, window_bounds = array<i64: 1, 128>}, {pipeline_mode = #tpu.pipeline_mode<synchronous>, transform_indices = @transform_3, window_bounds = array<i64: 1, 128>}, {transform_indices = @transform_4, window_bounds = array<i64: 1, 128, 128>}]} {
    %c0 = arith.constant 0 : index
    %c0_0 = arith.constant 0 : index
    %c0_1 = arith.constant 0 : index
    %c0_2 = arith.constant 0 : index
    %0 = vector.load %arg1[%c0, %c0_0, %c0_1, %c0_2] : memref<1x10x18x4xbf16, #tpu.memory_space<vmem>>, vector<1x10x18x4xbf16>
    %1 = vector.shape_cast %0 : vector<1x10x18x4xbf16> to vector<10x18x4xbf16>
    %2 = vector.extract_strided_slice %1 {offsets = [0, 0, 0], sizes = [8, 16, 4], strides = [1, 1, 1]} : vector<10x18x4xbf16> to vector<8x16x4xbf16>
    %3 = vector.extract_strided_slice %1 {offsets = [0, 1, 0], sizes = [8, 16, 4], strides = [1, 1, 1]} : vector<10x18x4xbf16> to vector<8x16x4xbf16>
    %4 = vector.extract_strided_slice %1 {offsets = [0, 2, 0], sizes = [8, 16, 4], strides = [1, 1, 1]} : vector<10x18x4xbf16> to vector<8x16x4xbf16>
    %5 = vector.extract_strided_slice %1 {offsets = [1, 0, 0], sizes = [8, 16, 4], strides = [1, 1, 1]} : vector<10x18x4xbf16> to vector<8x16x4xbf16>
    %6 = vector.extract_strided_slice %1 {offsets = [1, 1, 0], sizes = [8, 16, 4], strides = [1, 1, 1]} : vector<10x18x4xbf16> to vector<8x16x4xbf16>
    %7 = vector.extract_strided_slice %1 {offsets = [1, 2, 0], sizes = [8, 16, 4], strides = [1, 1, 1]} : vector<10x18x4xbf16> to vector<8x16x4xbf16>
    %8 = vector.extract_strided_slice %1 {offsets = [2, 0, 0], sizes = [8, 16, 4], strides = [1, 1, 1]} : vector<10x18x4xbf16> to vector<8x16x4xbf16>
    %9 = vector.extract_strided_slice %1 {offsets = [2, 1, 0], sizes = [8, 16, 4], strides = [1, 1, 1]} : vector<10x18x4xbf16> to vector<8x16x4xbf16>
    %10 = vector.extract_strided_slice %1 {offsets = [2, 2, 0], sizes = [8, 16, 4], strides = [1, 1, 1]} : vector<10x18x4xbf16> to vector<8x16x4xbf16>
    %11 = tpu.concatenate %2, %3, %4, %5, %6, %7, %8, %9, %10 in 2 : vector<8x16x4xbf16>, vector<8x16x4xbf16>, vector<8x16x4xbf16>, vector<8x16x4xbf16>, vector<8x16x4xbf16>, vector<8x16x4xbf16>, vector<8x16x4xbf16>, vector<8x16x4xbf16>, vector<8x16x4xbf16> -> vector<8x16x36xbf16>
    %12 = vector.shape_cast %11 : vector<8x16x36xbf16> to vector<128x36xbf16>
    %c0_3 = arith.constant 0 : index
    %c0_4 = arith.constant 0 : index
    %13 = vector.load %arg2[%c0_3, %c0_4] : memref<36x128xbf16, #tpu.memory_space<vmem>>, vector<36x128xbf16>
    %cst = arith.constant dense<0.000000e+00> : vector<128x128xf32>
    %14 = tpu.matmul %12, %13, %cst {dimension_numbers = #tpu.dot_dimension_numbers<[1], [0], [0], [1], [0, 0, 1, 1], [], []>} : vector<128x36xbf16>, vector<36x128xbf16>, vector<128x128xf32> -> vector<128x128xf32>
    %c0_5 = arith.constant 0 : index
    %c0_6 = arith.constant 0 : index
    %15 = vector.load %arg3[%c0_5, %c0_6] : memref<1x128xf32, #tpu.memory_space<vmem>>, vector<1x128xf32>
    %16 = vector.shape_cast %15 : vector<1x128xf32> to vector<128xf32>
    %17 = vector.shape_cast %16 : vector<128xf32> to vector<1x128xf32>
    %18 = vector.broadcast %17 : vector<1x128xf32> to vector<128x128xf32>
    %19 = arith.mulf %14, %18 : vector<128x128xf32>
    %c0_7 = arith.constant 0 : index
    %c0_8 = arith.constant 0 : index
    %20 = vector.load %arg4[%c0_7, %c0_8] : memref<1x128xf32, #tpu.memory_space<vmem>>, vector<1x128xf32>
    %21 = vector.shape_cast %20 : vector<1x128xf32> to vector<128xf32>
    %22 = vector.shape_cast %21 : vector<128xf32> to vector<1x128xf32>
    %23 = vector.broadcast %22 : vector<1x128xf32> to vector<128x128xf32>
    %24 = arith.addf %19, %23 : vector<128x128xf32>
    %cst_9 = arith.constant 0.000000e+00 : f32
    %25 = vector.broadcast %cst_9 : f32 to vector<128x128xf32>
    %26 = arith.maximumf %24, %25 : vector<128x128xf32>
    %c0_10 = arith.constant 0 : index
    %c0_11 = arith.constant 0 : index
    %c0_12 = arith.constant 0 : index
    %27 = vector.load %arg5[%c0_10, %c0_11, %c0_12] : memref<1x128x128xf32, #tpu.memory_space<vmem>>, vector<1x128x128xf32>
    %28 = vector.shape_cast %27 : vector<1x128x128xf32> to vector<128x128xf32>
    %29 = vector.shape_cast %26 : vector<128x128xf32> to vector<1x128x128xf32>
    tpu.vector_store %arg5[%c0_10, %c0_11, %c0_12], %29 {strides = array<i32>} : memref<1x128x128xf32, #tpu.memory_space<vmem>>, vector<1x128x128xf32>,
    return
  }
  func.func @transform_0(%arg0: i32) -> (i32, i32, i32, i32) {
    %c0_i32 = arith.constant 0 : i32
    %c0_i32_0 = arith.constant 0 : i32
    %c0_i32_1 = arith.constant 0 : i32
    %c0_i32_2 = arith.constant 0 : i32
    return %arg0, %c0_i32, %c0_i32_0, %c0_i32_1 : i32, i32, i32, i32
  }
  func.func @transform_1(%arg0: i32) -> (i32, i32) {
    %c0_i32 = arith.constant 0 : i32
    %c0_i32_0 = arith.constant 0 : i32
    %c0_i32_1 = arith.constant 0 : i32
    return %c0_i32, %c0_i32_0 : i32, i32
  }
  func.func @transform_2(%arg0: i32) -> (i32, i32) {
    %c0_i32 = arith.constant 0 : i32
    %c0_i32_0 = arith.constant 0 : i32
    %c0_i32_1 = arith.constant 0 : i32
    return %c0_i32, %c0_i32_0 : i32, i32
  }
  func.func @transform_3(%arg0: i32) -> (i32, i32) {
    %c0_i32 = arith.constant 0 : i32
    %c0_i32_0 = arith.constant 0 : i32
    %c0_i32_1 = arith.constant 0 : i32
    return %c0_i32, %c0_i32_0 : i32, i32
  }
  func.func @transform_4(%arg0: i32) -> (i32, i32, i32) {
    %c0_i32 = arith.constant 0 : i32
    %c0_i32_0 = arith.constant 0 : i32
    %c0_i32_1 = arith.constant 0 : i32
    return %arg0, %c0_i32, %c0_i32_0 : i32, i32, i32
  }
}

</mosaic_0001>

<bundles_post_ra>
// kernel: conv3x3_bn_relu.1
= control target key start
LH: loop header
LB: loop body
LE: loop exit
PB: predicated region body
PF: predicated region fallthrough
CT: control target
= control target key end

     0   :  { %s1090_s15 = smov 0   ;;  %s1511_s0 = inlined_call_operand.vmem [shape: bf16[4,10,18,4], index: 0, kind: input, shape index: {}]   ;;  %s1512_s1 = inlined_call_operand.vmem [shape: bf16[36,128], index: 1, kind: input, shape index: {}]   ;;  %s1513_s2 = inlined_call_operand.vmem [shape: f32[1,128], index: 2, kind: input, shape index: {}]   ;;  %s1514_s3 = inlined_call_operand.vmem [shape: f32[1,128], index: 3, kind: input, shape index: {}]   ;;  %s1515_s4 = inlined_call_operand.vmem [shape: f32[4,128,128], index: 4, kind: output, shape index: {}]  }
   0x1 LB: > { %s942_s16 = sadd.s32 4294967295, %s1055_s15   ;;  %p946_p0 = scmp.ge.s32.totalorder %s1055_s15, 1  ;;  %s1055_s15 = sphi %s1090_s15, %s14_s15  }
   0x2   : > { %p162_p1 = scmp.lt.s32.totalorder %s1055_s15, 5 }
   0x4   : > { %p163_p2 = pnand %p946_p0, %p162_p1 }
   0x5   : > { %p188_p3 = scmp.lt.s32.totalorder (!%p163_p2), %s942_s16, 3  ;;  %s1057_s21 = smov (!%p163_p2), 12  }
   0x6   : > { %166 = sbr.rel (%p163_p2) target bundleno = 450 (0x1c2), region = 36  ;;  %s1058_s22 = smov (!%p163_p2), 8  }
   0x7   : > { %s1059_s23 = smov (!%p163_p2), 4   ;;  %s1060_s24 = smov (!%p163_p2), 20  }
   0x8   : > { %s1061_s25 = smov (!%p163_p2), 16   ;;  %s1062_s26 = smov (!%p163_p2), 24  }
   0x9   : > { %s1063_s27 = smov (!%p163_p2), 28   ;;  %s1064_s28 = smov (!%p163_p2), 32  }
   0xb   : > { %s1517_s16 = smov (!%p188_p3, %s942_s16), 3  ;;  %vm406_vm0 = vcmask 1046528   ;;  %vm293_vm1 = vsmask.f32 7424  ;;  %vm762_vm2 = vcmask 1041408   ;;  %vm589_vm3 = vcmask 31744  }
   0xc   : > { %s1030_s17 = smul.u32 120, %s1517_s16  ;;  %vm606_vm4 = vcmask 64512   ;;  %vm623_vm5 = vcmask 97280   ;;  %vm640_vm6 = vcmask 130048   ;;  %vm657_vm7 = vcmask 162816   ;;  %s1008_s13 = sshll.u32 %s1517_s16, 7 }
   0xd   : > { %vm674_vm8 = vcmask 195584   ;;  %vm708_vm9 = vcmask 261120   ;;  %vm691_vm10 = vcmask 228352   ;;  %vm745_vm11 = vcmask 293888   ;;  %s1461_s18 = scalar_lea.vmem %s1515_s4, %s1008_s13 }
   0xe   : > { %s1104_s20 = scalar_lea.vmem %s1511_s0, %s1030_s17 }
   0xf   : > { %v1107_v0 = vld [vmem:[%s1104_s20 + $0x30] sm:$0xff]  ;;  %v213_v1 = vld [vmem:[%s1104_s20 + $0x38] sm:$0x1]  ;;  %v1111_v2 = vld [vmem:[%s1104_s20 + $0x48] sm:$0xff] }
  0x10   : > { %v281_v3 = vunpack.c.l.b16 %v213_v1  ;;  %v219_v4 = vld [vmem:[%s1104_s20 + $0x50] sm:$0x1]  ;;  %v343_v5 = vshrl.u32 %v1107_v0, 16  ;;  %v345_v6 = vshll.u32 %v1107_v0, 16  ;;  %v222_v8 = vld [vmem:[%s1104_s20 + $0x5c] sm:$0x1] }
  0x11   : > { %v283_v7 = vunpack.c.l.b16 %v219_v4  ;;  %v1118_v9 = vld [vmem:[%s1104_s20 + $0x3c] sm:$0xff]  ;;  %v419_v11 = vrot.slane %v1107_v0, 1  ;;  %v369_v12 = vshll.u32 %v1111_v2, 16  ;;  %v1123_v15 = vld [vmem:[%s1104_s20 + $0x54] sm:$0xff]  ;;  %v284_v18 = vunpack.c.l.b16 %v222_v8  ;;  %v216_v19 = vld [vmem:[%s1104_s20 + $0x44] sm:$0x1] }
  0x12   : > { %v289_v10 = vpack.c.b16 %v281_v3, %v281_v3  ;;  %v347_v13 = vrot.slane %v345_v6, 1  ;;  %460 = vrot.lane.b32.xlu2 %v1118_v9, %s1057_s21  ;;  %v367_v21 = vshrl.u32 %v1111_v2, 16  ;;  %v381_v26 = vshll.u32 %v1123_v15, 16  ;;  %v207_v49 = vld [vmem:[%s1104_s20 + $0x20] sm:$0x1]  ;;  %v1168_v54 = vld [vmem:[%s1104_s20 + $0x18] sm:$0xff] }
  0x13   : > { %v291_v14 = vpack.c.b16 %v283_v7, %v283_v7  ;;  %v371_v24 = vrot.slane %v369_v12, 1  ;;  %v282_v27 = vunpack.c.l.b16 %v216_v19  ;;  %v425_v29 = vrot.slane %v1111_v2, 1  ;;  %v201_v52 = vld [vmem:[%s1104_s20 + $0x8] sm:$0x1]  ;;  %v1174_v57 = vld [vmem:[%s1104_s20] sm:$0xff] }
  0x14   : > { %v420_v16 = vrot.slane %v289_v10, 1  ;;  %v350_v17 = vshll.u32 %v289_v10, 16  ;;  %v348_v20 = vor.u32 %v347_v13, %v343_v5  ;;  %v292_v31 = vpack.c.b16 %v284_v18, %v284_v18  ;;  %v1183_v63 = vld [vmem:[%s1104_s20 + $0x60] sm:$0xff]  ;;  %v225_v4 = vld [vmem:[%s1104_s20 + $0x68] sm:$0x1] }
  0x15   : > { %v374_v25 = vshll.u32 %v291_v14, 16  ;;  %v426_v30 = vrot.slane %v291_v14, 1  ;;  %v372_v32 = vor.u32 %v371_v24, %v367_v21  ;;  %v290_v34 = vpack.c.b16 %v282_v27, %v282_v27 }
  0x16   : > { %v1130_v22 = vsel %vm406_vm0, %v419_v11, %v420_v16  ;;  %v352_v23 = vrot.slane %v350_v17, 1  ;;  %v357_v35 = vshll.u32 %v1118_v9, 16  ;;  %v379_v36 = vshrl.u32 %v1123_v15, 16 }
  0x17   : > { %439 = vrot.lane.b32.xlu1 %v1130_v22, %s1058_s22  ;;  %v376_v33 = vrot.slane %v374_v25, 1  ;;  %v383_v37 = vrot.slane %v381_v26, 1  ;;  %v1146_v38 = vsel %vm406_vm0, %v425_v29, %v426_v30  ;;  %v386_v39 = vshll.u32 %v292_v31, 16  ;;  %v210_v30 = vld [vmem:[%s1104_s20 + $0x2c] sm:$0x1] }
  0x18   : > { %v1136_v28 = vsel %vm293_vm1, %v348_v20, %v352_v23  ;;  %v422_v40 = vrot.slane %v1118_v9, 1  ;;  %v423_v41 = vrot.slane %v290_v34, 1  ;;  %v355_v43 = vshrl.u32 %v1118_v9, 16 }
  0x19   : > { %398 = vrot.lane.b32.xlu0 %v1136_v28, %s1059_s23  ;;  %v1150_v42 = vsel %vm293_vm1, %v372_v32, %v376_v33  ;;  %v359_v44 = vrot.slane %v357_v35, 1  ;;  %v362_v45 = vshll.u32 %v290_v34, 16  ;;  %v384_v46 = vor.u32 %v383_v37, %v379_v36  ;;  %v204_v33 = vld [vmem:[%s1104_s20 + $0x14] sm:$0x1]  ;;  %v1217_v37 = vld [vmem:[%s1104_s20 + $0x24] sm:$0xff] }
  0x1a   : > { %464 = vrot.lane.b32.xlu2 %v1123_v15, %s1057_s21  ;;  %v388_v47 = vrot.slane %v386_v39, 1  ;;  %v1156_v48 = vsel %vm406_vm0, %v422_v40, %v423_v41  ;;  %v279_v55 = vunpack.c.l.b16 %v207_v49  ;;  %v277_v58 = vunpack.c.l.b16 %v201_v52 }
  0x1b   : > { %v360_v50 = vor.u32 %v359_v44, %v355_v43  ;;  %v364_v51 = vrot.slane %v362_v45, 1  ;;  %v321_v60 = vshll.u32 %v1168_v54, 16  ;;  %v428_v61 = vrot.slane %v1123_v15, 1  ;;  %v1223_v43 = vld [vmem:[%s1104_s20 + $0xc] sm:$0xff] }
  0x1c   : > { %v1165_v53 = vsel %vm293_vm1, %v384_v46, %v388_v47  ;;  %v287_v59 = vpack.c.b16 %v279_v55, %v279_v55  ;;  %v429_v62 = vrot.slane %v292_v31, 1  ;;  %v285_v1 = vpack.c.b16 %v277_v58, %v277_v58 }
  0x1d   : > { %v1171_v56 = vsel %vm293_vm1, %v360_v50, %v364_v51  ;;  %v297_v3 = vshll.u32 %v1174_v57, 16  ;;  %v319_v5 = vshrl.u32 %v1168_v54, 16  ;;  %v323_v6 = vrot.slane %v321_v60, 1 }
  0x1e   : > { %v326_v7 = vshll.u32 %v287_v59, 16  ;;  %v1191_v8 = vsel %vm406_vm0, %v428_v61, %v429_v62  ;;  %v295_v10 = vshrl.u32 %v1174_v57, 16  ;;  %v302_v12 = vshll.u32 %v285_v1, 16 }
  0x1f   : > { %443 = vrot.lane.b32.xlu1 %v1146_v38, %s1058_s22  ;;  %v299_v11 = vrot.slane %v297_v3, 1  ;;  %v469_v13 = vunpack.c.l.b16 %v225_v4  ;;  %v324_v14 = vor.u32 %v323_v6, %v319_v5  ;;  %v474_v20 = vshll.u32 %v1183_v63, 16 }
  0x20   : > { %v328_v16 = vrot.slane %v326_v7, 1  ;;  %v304_v18 = vrot.slane %v302_v12, 1  ;;  %v413_v23 = vrot.slane %v1168_v54, 1  ;;  %v414_v24 = vrot.slane %v287_v59, 1 }
  0x21   : > { %402 = vrot.lane.b32.xlu0 %v1150_v42, %s1059_s23  ;;  %v300_v17 = vor.u32 %v299_v11, %v295_v10  ;;  %v470_v19 = vpack.c.b16 %v469_v13, %v469_v13  ;;  %v472_v26 = vshrl.u32 %v1183_v63, 16  ;;  %v476_v27 = vrot.slane %v474_v20, 1 }
  0x22   : > { %510 = vrot.lane.b32.xlu2 %v1156_v48, %s1060_s24  ;;  %v1202_v21 = vsel %vm293_vm1, %v324_v14, %v328_v16  ;;  %v407_v31 = vrot.slane %v1174_v57, 1  ;;  %v408_v32 = vrot.slane %v285_v1, 1  ;;  %v1213_v34 = vsel %vm406_vm0, %v413_v23, %v414_v24  ;;  %v1018_v23 = vld [vmem:[%s1104_s20 + $0x6c] sm:$0xff] }
  0x23   : > { %v305_v25 = vsel %vm293_vm1, %v300_v17, %v304_v18  ;;  %v479_v29 = vshll.u32 %v470_v19, 16  ;;  %v477_v35 = vor.u32 %v476_v27, %v472_v26  ;;  %v280_v39 = vunpack.c.l.b16 %v210_v30 }
  0x24   : > { %v278_v40 = vunpack.c.l.b16 %v204_v33  ;;  %v409_v41 = vsel %vm406_vm0, %v407_v31, %v408_v32  ;;  %v333_v44 = vshll.u32 %v1217_v37, 16  ;;  %v499_v47 = vrot.slane %v1183_v63, 1 }
  0x25   : > { %v481_v36 = vrot.slane %v479_v29, 1  ;;  %v288_v46 = vpack.c.b16 %v280_v39, %v280_v39  ;;  %v500_v49 = vrot.slane %v470_v19, 1  ;;  %v309_v51 = vshll.u32 %v1223_v43, 16  ;;  %v228_v19 = vld [vmem:[%s1104_s20 + $0x74] sm:$0x1] }
  0x26   : > { %v286_v50 = vpack.c.b16 %v278_v40, %v278_v40  ;;  %v331_v52 = vshrl.u32 %v1217_v37, 16  ;;  %v335_v55 = vrot.slane %v333_v44, 1  ;;  %v307_v60 = vshrl.u32 %v1223_v43, 16 }
  0x27   : > { %495 = vrot.lane.b32.xlu1 %v1165_v53, %s1061_s25  ;;  %v482_v45 = vsel %vm293_vm1, %v477_v35, %v481_v36  ;;  %v338_v58 = vshll.u32 %v288_v46, 16  ;;  %v501_v59 = vsel %vm406_vm0, %v499_v47, %v500_v49  ;;  %v311_v61 = vrot.slane %v309_v51, 1  ;;  %v1019_v47 = vld [vmem:[%s1512_s1] sm:$0xff] }
  0x28   : > { %v314_v62 = vshll.u32 %v286_v50, 16  ;;  %v336_v1 = vor.u32 %v335_v55, %v331_v52  ;;  %v416_v10 = vrot.slane %v1217_v37, 1  ;;  %v417_v11 = vrot.slane %v288_v46, 1 }
  0x29   : > { %491 = vrot.lane.b32.xlu0 %v1171_v56, %s1061_s25  ;;  %v340_v3 = vrot.slane %v338_v58, 1  ;;  %v312_v4 = vor.u32 %v311_v61, %v307_v60  ;;  %v410_v12 = vrot.slane %v1223_v43, 1  ;;  %v411_v13 = vrot.slane %v286_v50, 1 }
  0x2a   : > { %535 = vrot.lane.b32.xlu2 %v1183_v63, %s1062_s26  ;;  %v316_v5 = vrot.slane %v314_v62, 1  ;;  %v1253_v14 = vsel %vm406_vm0, %v416_v10, %v417_v11  ;;  %v540_v20 = vunpack.c.l.b16 %v228_v19 }
  0x2b   : > { %v1238_v6 = vsel %vm293_vm1, %v336_v1, %v340_v3  ;;  %v1256_v16 = vsel %vm406_vm0, %v410_v12, %v411_v13 }
  0x2c   : > { %v317_v7 = vsel %vm293_vm1, %v312_v4, %v316_v5  ;;  %v541_v24 = vpack.c.b16 %v540_v20, %v540_v20 }
  0x2e   : > { %v550_v29 = vshll.u32 %v541_v24, 16  ;;  %v571_v50 = vrot.slane %v541_v24, 1 }
  0x2f   : > { %531 = vrot.lane.b32.xlu1 %v1111_v2, %s1062_s26 }
  0x30   : > { %v552_v30 = vrot.slane %v550_v29, 1 }
  0x31   : > { %514 = vrot.lane.b32.xlu0 %v1191_v8, %s1060_s24 }
  0x32   : > { %562 = vrot.lane.b32.xlu2 %v1150_v42, %s1063_s27 }
  0x37   : > { %394 = vrot.lane.b32.xlu1 %v1202_v21, %s1059_s23 }
  0x39   : > { %390 = vrot.lane.b32.xlu0 %v305_v25, %s1059_s23  ;;  %v545_v25 = vshll.u32 %v1018_v23, 16 }
  0x3a   : > { %435 = vrot.lane.b32.xlu2 %v1213_v34, %s1058_s22 }
  0x3b   : > { %v547_v27 = vrot.slane %v545_v25, 1 }
  0x3f   : > { %431 = vrot.lane.b32.xlu1 %v409_v41, %s1058_s22 }
  0x41   : > { %566 = vrot.lane.b32.xlu0 %v482_v45, %s1063_s27 }
  0x42   : > { %452 = vrot.lane.b32.xlu2 %v1223_v43, %s1057_s21 }
  0x47   : > { %585 = vrot.lane.b32.xlu1 %v501_v59, %s1064_s28 }
  0x49   : > { %581 = vrot.lane.b32.xlu0 %v1146_v38, %s1064_s28 }
  0x4a   : > { %487 = vrot.lane.b32.xlu2 %v1238_v6, %s1061_s25 }
  0x4f   : > { %483 = vrot.lane.b32.xlu1 %v317_v7, %s1061_s25 }
  0x51   : > { %456 = vrot.lane.b32.xlu0 %v1217_v37, %s1057_s21 }
  0x52   : > { %523 = vrot.lane.b32.xlu2 %v1168_v54, %s1062_s26 }
  0x57   : > { %506 = vrot.lane.b32.xlu1 %v1253_v14, %s1060_s24 }
  0x59   : > { %502 = vrot.lane.b32.xlu0 %v1256_v16, %s1060_s24 }
  0x5a   : > { %558 = vrot.lane.b32.xlu2 %v1136_v28, %s1063_s27 }
  0x5f   : > { %554 = vrot.lane.b32.xlu1 %v1202_v21, %s1063_s27 }
  0x61   : > { %527 = vrot.lane.b32.xlu0 %v1107_v0, %s1062_s26 }
  0x62   : > { %400 = vrot.lane.b32.xlu2 %v1171_v56, %s1059_s23 }
  0x67   : > { %577 = vrot.lane.b32.xlu1 %v1130_v22, %s1064_s28 }
  0x69   : > { %573 = vrot.lane.b32.xlu0 %v1213_v34, %s1064_s28 }
  0x6a   : > { %445 = vrot.lane.b32.xlu2 %v1191_v8, %s1058_s22 }
  0x6c   : > { %v1276_v17 = vpop.permute.xlu2 %460 }
  0x6f   : > { %441 = vrot.lane.b32.xlu1 %v1156_v48, %s1058_s22 }
  0x71   : > { %404 = vrot.lane.b32.xlu0 %v1165_v53, %s1059_s23 }
  0x72   : > { %493 = vrot.lane.b32.xlu2 %v1150_v42, %s1061_s25  ;;  %v543_v42 = vshrl.u32 %v1018_v23, 16 }
  0x74   : > { %v1284_v18 = vpop.permute.xlu2 %464 }
  0x77   : > { %466 = vrot.lane.b32.xlu1 %v1183_v63, %s1057_s21  ;;  %v548_v63 = vor.u32 %v547_v27, %v543_v42 }
  0x79   : > { %462 = vrot.lane.b32.xlu0 %v1111_v2, %s1057_s21  ;;  %v553_v32 = vsel %vm293_vm1, %v548_v63, %v552_v30 }
  0x7a   : > { %516 = vrot.lane.b32.xlu2 %v501_v59, %s1060_s24 }
  0x7c   : > { %v1293_v26 = vpop.permute.xlu2 %510 }
  0x7f   : > { %512 = vrot.lane.b32.xlu1 %v1146_v38, %s1060_s24  ;;  %v729_v38 = vld [vmem:[%s1512_s1 + $0x10] sm:$0x3] }
  0x80   : > { %v739_v36 = vunpack.c.l.b16 %v729_v38 }
  0x81   : > { %497 = vrot.lane.b32.xlu0 %v482_v45, %s1061_s25  ;;  %v1020_v45 = vld [vmem:[%s1512_s1 + $0x8] sm:$0xff] }
  0x82   : > { %392 = vrot.lane.b32.xlu2 %v317_v7, %s1059_s23  ;;  %v742_v40 = vpack.c.b16 %v739_v36, %v739_v36 }
  0x84   : > { %v1299_v31 = vpop.permute.xlu2 %535  ;;  %v764_v41 = vsel %vm762_vm2, %v742_v40, 0 }
  0x85   : > { %1023 = vmatpush.bf16.msra.mxu3 %v764_v41  ;;  %1022 = vmatpush.bf16.msra.mxu2 %v764_v41 }
  0x86   : > { %1021 = vmatpush.bf16.msra.mxu1 %v764_v41  ;;  %771 = vmatpush.bf16.msra.mxu0 %v764_v41 }
  0x87   : > { %537 = vrot.lane.b32.xlu1 %v1018_v23, %s1062_s26 }
  0x89   : > { %v440_v33 = vpop.permute.xlu1 %439  ;;  %533 = vrot.lane.b32.xlu0 %v1123_v15, %s1062_s26  ;;  %1026 = vmatpush.bf16.msra.mxu3 %v1020_v45 }
  0x8a   : > { %568 = vrot.lane.b32.xlu2 %v553_v32, %s1063_s27  ;;  %1025 = vmatpush.bf16.msra.mxu2 %v1020_v45 }
  0x8b   : > { %v399_v35 = vpop.permute.xlu0 %398  ;;  %1024 = vmatpush.bf16.msra.mxu1 %v1020_v45  ;;  %772 = vmatpush.bf16.msra.mxu0 %v1020_v45 }
  0x8c   : > { %v1309_v39 = vpop.permute.xlu2 %562  ;;  %v599_v1 = vsel %vm589_vm3, %v1107_v0, %v399_v35 }
  0x8d   : > { %1029 = vmatpush.bf16.msra.mxu3 %v1019_v47 }
  0x8e   : > { %1028 = vmatpush.bf16.msra.mxu2 %v1019_v47 }
  0x8f   : > { %564 = vrot.lane.b32.xlu1 %v1165_v53, %s1063_s27  ;;  %1027 = vmatpush.bf16.msra.mxu1 %v1019_v47 }
  0x90   : > { %773 = vmatpush.bf16.msra.mxu0 %v1019_v47 }
  0x91   : > { %v444_v44 = vpop.permute.xlu1 %443  ;;  %396 = vrot.lane.b32.xlu0 %v1238_v6, %s1059_s23 }
  0x92   : > { %583 = vrot.lane.b32.xlu2 %v1191_v8, %s1064_s28  ;;  %v570_v8 = vrot.slane %v1018_v23, 1 }
  0x93   : > { %v403_v46 = vpop.permute.xlu0 %402 }
  0x94   : > { %v1320_v53 = vpop.permute.xlu2 %435  ;;  %v572_v55 = vsel %vm406_vm0, %v570_v8, %v571_v50 }
  0x97   : > { %437 = vrot.lane.b32.xlu1 %v1253_v14, %s1058_s22 }
  0x99   : > { %v496_v49 = vpop.permute.xlu1 %495  ;;  %433 = vrot.lane.b32.xlu0 %v1256_v16, %s1058_s22 }
  0x9a   : > { %458 = vrot.lane.b32.xlu2 %v1107_v0, %s1057_s21 }
  0x9b   : > { %v492_v51 = vpop.permute.xlu0 %491 }
  0x9c   : > { %v1331_v52 = vpop.permute.xlu2 %452 }
  0x9f   : > { %454 = vrot.lane.b32.xlu1 %v1168_v54, %s1057_s21 }
  0xa1   : > { %v532_v58 = vpop.permute.xlu1 %531  ;;  %587 = vrot.lane.b32.xlu0 %v572_v55, %s1064_s28 }
  0xa2   : > { %504 = vrot.lane.b32.xlu2 %v1213_v34, %s1060_s24  ;;  %v603_v34 = vsel %vm589_vm3, %v1111_v2, %v403_v46 }
  0xa3   : > { %v515_v59 = vpop.permute.xlu0 %514  ;;  %v620_v3 = vsel %vm606_vm4, %v603_v34, %v444_v44 }
  0xa4   : > { %v488_v60 = vpop.permute.xlu2 %487  ;;  %v637_v0 = vsel %vm623_vm5, %v620_v3, %v1284_v18 }
  0xa5   : > { %v654_v7 = vsel %vm640_vm6, %v637_v0, %v496_v49 }
  0xa6   : > { %v671_v11 = vsel %vm657_vm7, %v654_v7, %v515_v59 }
  0xa7   : > { %489 = vrot.lane.b32.xlu1 %v1136_v28, %s1061_s25  ;;  %v616_v28 = vsel %vm606_vm4, %v599_v1, %v440_v33  ;;  %v688_v13 = vsel %vm674_vm8, %v671_v11, %v1299_v31 }
  0xa8   : > { %v633_v2 = vsel %vm623_vm5, %v616_v28, %v1276_v17 }
  0xa9   : > { %v395_v61 = vpop.permute.xlu1 %394  ;;  %485 = vrot.lane.b32.xlu0 %v1202_v21, %s1061_s25  ;;  %v650_v10 = vsel %vm640_vm6, %v633_v2, %v492_v51 }
  0xaa   : > { %529 = vrot.lane.b32.xlu2 %v1118_v9, %s1062_s26  ;;  %v595_v42 = vsel %vm589_vm3, %v1168_v54, %v395_v61 }
  0xab   : > { %v391_v62 = vpop.permute.xlu0 %390  ;;  %v612_v29 = vsel %vm606_vm4, %v595_v42, %v1320_v53 }
  0xac   : > { %v524_v21 = vpop.permute.xlu2 %523  ;;  %v591_v63 = vsel %vm589_vm3, %v1174_v57, %v391_v62 }
  0xaf   : > { %525 = vrot.lane.b32.xlu1 %v1217_v37, %s1062_s26 }
  0xb1   : > { %v432_v4 = vpop.permute.xlu1 %431  ;;  %508 = vrot.lane.b32.xlu0 %v1130_v22, %s1060_s24  ;;  %v667_v22 = vsel %vm657_vm7, %v650_v10, %v1293_v26 }
  0xb2   : > { %575 = vrot.lane.b32.xlu2 %v1253_v14, %s1064_s28  ;;  %v684_v12 = vsel %vm674_vm8, %v667_v22, %v532_v58  ;;  %v608_v32 = vsel %vm606_vm4, %v591_v63, %v432_v4 }
  0xb3   : > { %v567_v5 = vpop.permute.xlu0 %566  ;;  %v625_v38 = vsel %vm623_vm5, %v608_v32, %v1331_v52 }
  0xb4   : > { %v705_v14 = vsel %vm691_vm10, %v688_v13, %v567_v5  ;;  %v559_v18 = vpop.permute.xlu2 %558 }
  0xb7   : > { %560 = vrot.lane.b32.xlu1 %v1171_v56, %s1063_s27  ;;  %v701_v56 = vsel %vm691_vm10, %v684_v12, %v1309_v39 }
  0xb9   : > { %v586_v16 = vpop.permute.xlu1 %585  ;;  %556 = vrot.lane.b32.xlu0 %v1238_v6, %s1063_s27 }
  0xba   : > { %v722_v17 = vsel %vm708_vm9, %v705_v14, %v586_v16 }
  0xbb   : > { %1004 = vmatmul.msk.bf16.vlgmr.msra.gmra.mxu3 %vm745_vm11, %v722_v17  ;;  %v582_v19 = vpop.permute.xlu0 %581 }
  0xbc   : > { %v718_v20 = vsel %vm708_vm9, %v701_v56, %v582_v19  ;;  %v401_v25 = vpop.permute.xlu2 %400 }
  0xbd   : > { %1002 = vmatmul.msk.bf16.vlgmr.msra.gmra.mxu2 %vm745_vm11, %v718_v20  ;;  %v601_v61 = vsel %vm589_vm3, %v1118_v9, %v401_v25 }
  0xc1   : > { %v484_v23 = vpop.permute.xlu1 %483  ;;  %579 = vrot.lane.b32.xlu0 %v1156_v48, %s1064_s28 }
  0xc2   : > { %v642_v35 = vsel %vm640_vm6, %v625_v38, %v484_v23 }
  0xc3   : > { %v457_v24 = vpop.permute.xlu0 %456 }
  0xc4   : > { %v446_v27 = vpop.permute.xlu2 %445  ;;  %v629_v30 = vsel %vm623_vm5, %v612_v29, %v457_v24 }
  0xc5   : > { %v646_v33 = vsel %vm640_vm6, %v629_v30, %v488_v60 }
  0xc9   : > { %v507_v6 = vpop.permute.xlu1 %506 }
  0xca   : > { %v663_v54 = vsel %vm657_vm7, %v646_v33, %v507_v6 }
  0xcb   : > { %v503_v26 = vpop.permute.xlu0 %502 }
  0xcc   : > { %v659_v39 = vsel %vm657_vm7, %v642_v35, %v503_v26  ;;  %v494_v57 = vpop.permute.xlu2 %493 }
  0xcd   : > { %v676_v44 = vsel %vm674_vm8, %v659_v39, %v524_v21 }
  0xd1   : > { %v555_v31 = vpop.permute.xlu1 %554 }
  0xd2   : > { %v693_v46 = vsel %vm691_vm10, %v676_v44, %v555_v31 }
  0xd3   : > { %v528_v48 = vpop.permute.xlu0 %527 }
  0xd4   : > { %v680_v36 = vsel %vm674_vm8, %v663_v54, %v528_v48  ;;  %v517_v8 = vpop.permute.xlu2 %516 }
  0xd5   : > { %v697_v41 = vsel %vm691_vm10, %v680_v36, %v559_v18 }
  0xd9   : > { %v578_v40 = vpop.permute.xlu1 %577 }
  0xda   : > { %v714_v45 = vsel %vm708_vm9, %v697_v41, %v578_v40 }
  0xdb   : > { %1000 = vmatmul.msk.bf16.vlgmr.msra.gmra.mxu1 %vm745_vm11, %v714_v45  ;;  %v574_v53 = vpop.permute.xlu0 %573 }
  0xdc   : > { %v710_v47 = vsel %vm708_vm9, %v693_v46, %v574_v53  ;;  %v393_v55 = vpop.permute.xlu2 %392  ;;  %v1447_v46 = vld [vmem:[%s1513_s2] ss:$0 sm:$0xff] }
  0xdd   : > { %998 = vmatmul.msk.bf16.vlgmr.msra.gmra.mxu0 %vm745_vm11, %v710_v47  ;;  %v593_v42 = vsel %vm589_vm3, %v1223_v43, %v393_v55  ;;  %v1452_v53 = vld [vmem:[%s1514_s3] ss:$0 sm:$0xff] }
  0xe1   : > { %v442_v49 = vpop.permute.xlu1 %441 }
  0xe2   : > { %v618_v1 = vsel %vm606_vm4, %v601_v61, %v442_v49 }
  0xe3   : > { %v405_v50 = vpop.permute.xlu0 %404 }
  0xe4   : > { %v569_v60 = vpop.permute.xlu2 %568  ;;  %v605_v9 = vsel %vm589_vm3, %v1123_v15, %v405_v50 }
  0xe5   : > { %v622_v22 = vsel %vm606_vm4, %v605_v9, %v446_v27 }
  0xe9   : > { %v467_v51 = vpop.permute.xlu1 %466 }
  0xea   : > { %v639_v12 = vsel %vm623_vm5, %v622_v22, %v467_v51 }
  0xeb   : > { %v463_v52 = vpop.permute.xlu0 %462 }
  0xec   : > { %v635_v28 = vsel %vm623_vm5, %v618_v1, %v463_v52  ;;  %v584_v4 = vpop.permute.xlu2 %583 }
  0xed   : > { %v652_v3 = vsel %vm640_vm6, %v635_v28, %v494_v57 }
  0xf1   : > { %v513_v58 = vpop.permute.xlu1 %512 }
  0xf2   : > { %v669_v21 = vsel %vm657_vm7, %v652_v3, %v513_v58 }
  0xf3   : > { %v498_v59 = vpop.permute.xlu0 %497 }
  0xf4   : > { %v656_v14 = vsel %vm640_vm6, %v639_v12, %v498_v59  ;;  %v459_v16 = vpop.permute.xlu2 %458 }
  0xf5   : > { %v673_v17 = vsel %vm657_vm7, %v656_v14, %v517_v8 }
  0xf9   : > { %v538_v62 = vpop.permute.xlu1 %537 }
  0xfa   : > { %v690_v18 = vsel %vm674_vm8, %v673_v17, %v538_v62 }
  0xfb   : > { %v534_v34 = vpop.permute.xlu0 %533  ;;  %v707_v19 = vsel %vm691_vm10, %v690_v18, %v569_v60 }
  0xfc   : > { %v686_v0 = vsel %vm674_vm8, %v669_v21, %v534_v34  ;;  %v505_v15 = vpop.permute.xlu2 %504 }
 0x101   : > { %v565_v2 = vpop.permute.xlu1 %564 }
 0x102   : > { %v703_v5 = vsel %vm691_vm10, %v686_v0, %v565_v2 }
 0x103   : > { %v397_v7 = vpop.permute.xlu0 %396  ;;  %v720_v10 = vsel %vm708_vm9, %v703_v5, %v584_v4 }
 0x104   : > { %1003 = vmatmul.msk.bf16.gmra.mxu2 %vm745_vm11, %v720_v10  ;;  %v530_v6 = vpop.permute.xlu2 %529  ;;  %v597_v31 = vsel %vm589_vm3, %v1217_v37, %v397_v7 }
 0x109   : > { %v438_v11 = vpop.permute.xlu1 %437 }
 0x10a   : > { %v614_v32 = vsel %vm606_vm4, %v597_v31, %v438_v11 }
 0x10b   : > { %v434_v13 = vpop.permute.xlu0 %433  ;;  %v631_v35 = vsel %vm623_vm5, %v614_v32, %v459_v16 }
 0x10c   : > { %v610_v27 = vsel %vm606_vm4, %v593_v42, %v434_v13  ;;  %v576_v33 = vpop.permute.xlu2 %575 }
 0x111   : > { %v455_v56 = vpop.permute.xlu1 %454 }
 0x112   : > { %v627_v29 = vsel %vm623_vm5, %v610_v27, %v455_v56 }
 0x113   : > { %v588_v20 = vpop.permute.xlu0 %587 }
 0x114   : > { %v724_v23 = vsel %vm708_vm9, %v707_v19, %v588_v20 }
 0x115   : > { %1005 = vmatmul.msk.bf16.gmra.mxu3 %vm745_vm11, %v724_v23 }
 0x119   : > { %v490_v25 = vpop.permute.xlu1 %489 }
 0x11a   : > { %v648_v39 = vsel %vm640_vm6, %v631_v35, %v490_v25 }
 0x11b   : > { %v486_v24 = vpop.permute.xlu0 %485 }
 0x11c   : > { %v644_v30 = vsel %vm640_vm6, %v627_v29, %v486_v24 }
 0x11d   : > { %v661_v48 = vsel %vm657_vm7, %v644_v30, %v505_v15 }
 0x121   : > { %v526_v63 = vpop.permute.xlu1 %525 }
 0x122   : > { %v678_v38 = vsel %vm674_vm8, %v661_v48, %v526_v63 }
 0x123   : > { %v509_v26 = vpop.permute.xlu0 %508 }
 0x124   : > { %v665_v37 = vsel %vm657_vm7, %v648_v39, %v509_v26 }
 0x125   : > { %v682_v40 = vsel %vm674_vm8, %v665_v37, %v530_v6 }
 0x129   : > { %v561_v57 = vpop.permute.xlu1 %560 }
 0x12a   : > { %v699_v41 = vsel %vm691_vm10, %v682_v40, %v561_v57 }
 0x12b   : > { %v557_v54 = vpop.permute.xlu0 %556 }
 0x12c   : > { %v695_v43 = vsel %vm691_vm10, %v678_v38, %v557_v54 }
 0x12d   : > { %v712_v36 = vsel %vm708_vm9, %v695_v43, %v576_v33 }
 0x12e   : > { %999 = vmatmul.msk.bf16.gmra.mxu0 %vm745_vm11, %v712_v36 }
 0x133   : > { %v580_v44 = vpop.permute.xlu0 %579 }
 0x134   : > { %v716_v45 = vsel %vm708_vm9, %v699_v41, %v580_v44 }
 0x135   : > { %1001 = vmatmul.msk.bf16.gmra.mxu1 %vm745_vm11, %v716_v45 }
 0x13e   : > { %v805_v47 = vpop.f32.mrf.mxu3 }
 0x13f   : > { %v831_v49 = vmul.f32 %v1447_v46, %v805_v47 }
 0x140   : > { %v795_v8 = vpop.f32.mrf.mxu2 }
 0x141   : > { %v851_v50 = vadd.f32 %v1452_v53, %v831_v49  ;;  %v827_v51 = vmul.f32 %v1447_v46, %v795_v8 }
 0x143   : > { %v867_v52 = vmax.f32 %v851_v50, 0.0  ;;  %v847_v55 = vadd.f32 %v1452_v53, %v827_v51 }
 0x145   : > { %883 = vst [vmem:[%s1461_s18 + $0x60] sm:$0xff] %v867_v52  ;;  %v863_v58 = vmax.f32 %v847_v55, 0.0 }
 0x146   : > { %v807_v59 = vpop.f32.mrf.mxu3 }
 0x147   : > { %879 = vst [vmem:[%s1461_s18 + $0x40] sm:$0xff] %v863_v58  ;;  %v832_v60 = vmul.f32 %v1447_v46, %v807_v59 }
 0x148   : > { %v797_v61 = vpop.f32.mrf.mxu2 }
 0x149   : > { %v852_v62 = vadd.f32 %v1452_v53, %v832_v60  ;;  %v828_v1 = vmul.f32 %v1447_v46, %v797_v61 }
 0x14b   : > { %v868_v34 = vmax.f32 %v852_v62, 0.0  ;;  %v848_v28 = vadd.f32 %v1452_v53, %v828_v1 }
 0x14d   : > { %884 = vst [vmem:[%s1461_s18 + $0x68] sm:$0xff] %v868_v34  ;;  %v864_v3 = vmax.f32 %v848_v28, 0.0 }
 0x14f   : > { %880 = vst [vmem:[%s1461_s18 + $0x48] sm:$0xff] %v864_v3 }
 0x158   : > { %v785_v21 = vpop.f32.mrf.mxu1 }
 0x159   : > { %v823_v4 = vmul.f32 %v1447_v46, %v785_v21 }
 0x15a   : > { %v775_v0 = vpop.f32.mrf.mxu0 }
 0x15b   : > { %v843_v2 = vadd.f32 %v1452_v53, %v823_v4  ;;  %v819_v5 = vmul.f32 %v1447_v46, %v775_v0 }
 0x15d   : > { %v859_v7 = vmax.f32 %v843_v2, 0.0  ;;  %v839_v10 = vadd.f32 %v1452_v53, %v819_v5 }
 0x15f   : > { %875 = vst [vmem:[%s1461_s18 + $0x20] sm:$0xff] %v859_v7  ;;  %v855_v9 = vmax.f32 %v839_v10, 0.0 }
 0x160   : > { %v787_v11 = vpop.f32.mrf.mxu1 }
 0x161   : > { %871 = vst [vmem:[%s1461_s18] sm:$0xff] %v855_v9  ;;  %v824_v22 = vmul.f32 %v1447_v46, %v787_v11 }
 0x162   : > { %v777_v12 = vpop.f32.mrf.mxu0 }
 0x163   : > { %v844_v13 = vadd.f32 %v1452_v53, %v824_v22  ;;  %v820_v14 = vmul.f32 %v1447_v46, %v777_v12 }
 0x165   : > { %v860_v16 = vmax.f32 %v844_v13, 0.0  ;;  %v840_v17 = vadd.f32 %v1452_v53, %v820_v14 }
 0x167   : > { %876 = vst [vmem:[%s1461_s18 + $0x28] sm:$0xff] %v860_v16  ;;  %v856_v18 = vmax.f32 %v840_v17, 0.0 }
 0x169   : > { %872 = vst [vmem:[%s1461_s18 + $0x8] sm:$0xff] %v856_v18 }
 0x187   : > { %v800_v56 = vpop.f32.mrf.mxu2 }
 0x188   : > { %v829_v19 = vmul.f32 %v1447_v46, %v800_v56 }
 0x18a   : > { %v849_v20 = vadd.f32 %v1452_v53, %v829_v19 }
 0x18c   : > { %v865_v23 = vmax.f32 %v849_v20, 0.0 }
 0x18e   : > { %881 = vst [vmem:[%s1461_s18 + $0x50] sm:$0xff] %v865_v23 }
 0x18f   : > { %v802_v15 = vpop.f32.mrf.mxu2 }
 0x190   : > { %v830_v24 = vmul.f32 %v1447_v46, %v802_v15 }
 0x192   : > { %v850_v25 = vadd.f32 %v1452_v53, %v830_v24 }
 0x194   : > { %v866_v6 = vmax.f32 %v850_v25, 0.0 }
 0x196   : > { %882 = vst [vmem:[%s1461_s18 + $0x58] sm:$0xff] %v866_v6 }
 0x198   : > { %v810_v26 = vpop.f32.mrf.mxu3 }
 0x199   : > { %v833_v42 = vmul.f32 %v1447_v46, %v810_v26 }
 0x19b   : > { %v853_v27 = vadd.f32 %v1452_v53, %v833_v42 }
 0x19d   : > { %v869_v29 = vmax.f32 %v853_v27, 0.0 }
 0x19f   : > { %885 = vst [vmem:[%s1461_s18 + $0x70] sm:$0xff] %v869_v29 }
 0x1a0   : > { %v812_v63 = vpop.f32.mrf.mxu3 }
 0x1a1   : > { %v834_v30 = vmul.f32 %v1447_v46, %v812_v63 }
 0x1a3   : > { %v854_v31 = vadd.f32 %v1452_v53, %v834_v30 }
 0x1a5   : > { %v870_v32 = vmax.f32 %v854_v31, 0.0 }
 0x1a7   : > { %886 = vst [vmem:[%s1461_s18 + $0x78] sm:$0xff] %v870_v32 }
 0x1ab   : > { %v780_v48 = vpop.f32.mrf.mxu0 }
 0x1ac   : > { %v821_v33 = vmul.f32 %v1447_v46, %v780_v48 }
 0x1ae   : > { %v841_v38 = vadd.f32 %v1452_v53, %v821_v33 }
 0x1b0   : > { %v857_v54 = vmax.f32 %v841_v38, 0.0 }
 0x1b2   : > { %873 = vst [vmem:[%s1461_s18 + $0x10] sm:$0xff] %v857_v54  ;;  %v790_v43 = vpop.f32.mrf.mxu1 }
 0x1b3   : > { %v825_v35 = vmul.f32 %v1447_v46, %v790_v43  ;;  %v782_v36 = vpop.f32.mrf.mxu0 }
 0x1b4   : > { %v822_v39 = vmul.f32 %v1447_v46, %v782_v36 }
 0x1b5   : > { %v845_v37 = vadd.f32 %v1452_v53, %v825_v35 }
 0x1b6   : > { %v842_v57 = vadd.f32 %v1452_v53, %v822_v39 }
 0x1b7   : > { %v861_v40 = vmax.f32 %v845_v37, 0.0 }
 0x1b8   : > { %v858_v41 = vmax.f32 %v842_v57, 0.0 }
 0x1b9   : > { %877 = vst [vmem:[%s1461_s18 + $0x30] sm:$0xff] %v861_v40 }
 0x1ba   : > { %874 = vst [vmem:[%s1461_s18 + $0x18] sm:$0xff] %v858_v41  ;;  %v792_v44 = vpop.f32.mrf.mxu1 }
 0x1bb   : > { %v826_v45 = vmul.f32 %v1447_v46, %v792_v44 }
 0x1bd   : > { %v846_v47 = vadd.f32 %v1452_v53, %v826_v45 }
 0x1bf   : > { %v862_v49 = vmax.f32 %v846_v47, 0.0 }
 0x1c1   : > { %878 = vst [vmem:[%s1461_s18 + $0x38] sm:$0xff] %v862_v49 }
 0x1c2 PF: > { %s14_s15 = sadd.s32 1, %s1055_s15  }
 0x1c3   : > { %p11_p4 = scmp.ge.s32.totalorder %s14_s15, 6  }
 0x1c5   :  { %13 = sbr.rel (!%p11_p4) target bundleno = 1 (0x1), region = 66 }

</bundles_post_ra>
